<compile_context>
chip_gen: v7x
topology: tpu7x:2x2x1
jax: 0.10.0
libtpu: 0.0.40
codegen_flags: <defaults>
</compile_context>

<pallas_src>
import functools
import math

import jax
import jax.numpy as jnp
from jax import lax
from jax.experimental import pallas as pl
from jax.experimental.pallas import tpu as pltpu


def _i32_const(v):
    """Wrap a uint32 literal into its int32 (two's complement) jnp scalar."""
    v &= 0xFFFFFFFF
    if v >= (1 << 31):
        v -= 1 << 32
    return jnp.int32(v)


def _uniform31(linear_idx, seed):
    """Counter-based hash -> non-negative int32 uniform in [0, 2^31).

    Pure int32 VPU ops (mul/xor/logical shift), so it lowers both under Mosaic
    and in interpret mode.  lowbias32-style finalizer gives good avalanche,
    plenty for dropout masks.
    """
    h = linear_idx + seed * _i32_const(0x9E3779B1)
    h = h ^ lax.shift_right_logical(h, 16)
    h = h * _i32_const(0x7FEB352D)
    h = h ^ lax.shift_right_logical(h, 15)
    h = h * _i32_const(0x846CA68B)
    h = h ^ lax.shift_right_logical(h, 16)
    return lax.shift_right_logical(h, 1)


def _dropout_consts(rate, dtype):
    # drop iff uniform31 < rate * 2^31 ; kept values scaled by 1/(1-rate)
    threshold = jnp.int32(min(int(rate * float(1 << 31)), (1 << 31) - 1))
    scale = jnp.asarray(1.0 / (1.0 - rate), dtype=dtype)
    return threshold, scale


def _pe_kernel_lane_dense(seed_ref, x_ref, pe_ref, o_ref, *, batch, d_model,
                          rate, training):
    # x_ref / o_ref: (ts, batch * d_model) -- seq rows on sublanes, features on lanes.
    # pe_ref:        (ts, d_model)         -- pe rows for this seq tile.
    pe = pe_ref[...].astype(o_ref.dtype)
    ts = x_ref.shape[0]

    apply_dropout = training and rate > 0.0
    if apply_dropout:
        seed = seed_ref[0]
        thr, scale = _dropout_consts(rate, o_ref.dtype)
        row0 = pl.program_id(0) * ts
        rows = lax.broadcasted_iota(jnp.int32, (ts, d_model), 0) + row0
        cols = lax.broadcasted_iota(jnp.int32, (ts, d_model), 1)
        # global element index (row-major over (S, B*D)); unique per element.
        base_idx = rows * (batch * d_model) + cols

    # Static unroll over batch lane-groups: each chunk is a lane-aligned
    # (ts, d_model) slab (d_model % 128 == 0 on this path), so loads/stores are
    # dense and the pe broadcast over batch needs no data movement.
    for b in range(batch):
        lo = b * d_model
        y = x_ref[:, lo:lo + d_model] + pe
        if apply_dropout:
            r = _uniform31(base_idx + lo, seed)
            y = jnp.where(r >= thr, y * scale, jnp.zeros_like(y))
        o_ref[:, lo:lo + d_model] = y.astype(o_ref.dtype)


def _pe_kernel_3d(seed_ref, x_ref, pe_ref, o_ref, *, rate, training):
    # Fallback path for small / lane-unaligned d_model.
    # x_ref / o_ref: (ts, B, D);  pe_ref: (ts, 1, D) broadcast over batch (sublanes).
    y = x_ref[...] + pe_ref[...].astype(o_ref.dtype)
    if training and rate > 0.0:
        ts, bsz, dm = x_ref.shape
        seed = seed_ref[0]
        thr, scale = _dropout_consts(rate, o_ref.dtype)
        shape = (ts, bsz, dm)
        rows = lax.broadcasted_iota(jnp.int32, shape, 0) + pl.program_id(0) * ts
        bidx = lax.broadcasted_iota(jnp.int32, shape, 1)
        cols = lax.broadcasted_iota(jnp.int32, shape, 2)
        linear = (rows * bsz + bidx) * dm + cols
        r = _uniform31(linear, seed)
        y = jnp.where(r >= thr, y * scale, jnp.zeros_like(y))
    o_ref[...] = y.astype(o_ref.dtype)


def make_positional_encoding_table(d_model, max_len=5000, dtype=jnp.float32):
    """Recreates the PyTorch module's `pe` buffer: shape (max_len, 1, d_model)."""
    position = jnp.arange(max_len, dtype=jnp.float32)[:, None]           # (L, 1)
    div_term = jnp.exp(jnp.arange(0, d_model, 2, dtype=jnp.float32)
                       * (-math.log(10000.0) / d_model))                 # (ceil(D/2),)
    angles = position * div_term                                         # (L, ceil(D/2))
    pe = jnp.zeros((max_len, 1, d_model), dtype=jnp.float32)
    pe = pe.at[:, 0, 0::2].set(jnp.sin(angles))
    pe = pe.at[:, 0, 1::2].set(jnp.cos(angles)[:, : d_model // 2])       # safe for odd D
    return pe.astype(dtype)


def _pick_seq_tile(seq_len, row_bytes, target_bytes):
    # Largest multiple-of-8 tile with ~target_bytes per x tile, clamped to seq_len.
    ts = (target_bytes // max(row_bytes, 1)) // 8 * 8
    ts = max(ts, 8)
    return min(ts, seq_len)


def positional_encoding(x, pe, *, rate=0.1, training=False, seed=0,
                        tile_bytes=2 * 1024 * 1024):
    """x: (S, B, D); pe: (max_len, 1, D). Returns dropout(x + pe[:S])."""
    S, B, D = x.shape
    max_len = pe.shape[0]
    if S > max_len:
        raise ValueError(f"seq_len {S} exceeds positional table max_len {max_len}")

    seed_arr = jnp.asarray([seed], dtype=jnp.int32)
    ts = _pick_seq_tile(S, B * D * x.dtype.itemsize, tile_bytes)
    n_tiles = pl.cdiv(S, ts)
    compiler_params = pltpu.CompilerParams(dimension_semantics=("parallel",))

    if D % 128 == 0:
        # Lane-dense path: free reshapes, no extra HBM traffic.
        x2 = x.reshape(S, B * D)
        pe2 = pe.reshape(max_len, D)
        if ts % 8 != 0:
            # Only possible when ts == S (single short tile): make the pe block
            # span its full first dim so the (8, 128) block rule holds.
            pe2 = pe2[:S]
        kernel = functools.partial(_pe_kernel_lane_dense, batch=B, d_model=D,
                                   rate=float(rate), training=bool(training))
        out = pl.pallas_call(
            kernel,
            out_shape=jax.ShapeDtypeStruct((S, B * D), x.dtype),
            grid_spec=pltpu.PrefetchScalarGridSpec(
                num_scalar_prefetch=1,                 # dropout seed in SMEM
                grid=(n_tiles,),
                in_specs=[
                    pl.BlockSpec((ts, B * D), lambda i, seed: (i, 0)),
                    pl.BlockSpec((ts, D), lambda i, seed: (i, 0)),
                ],
                out_specs=pl.BlockSpec((ts, B * D), lambda i, seed: (i, 0)),
            ),
            compiler_params=compiler_params,
        )(seed_arr, x2, pe2)
        return out.reshape(S, B, D)

    # Fallback: (ts, B, D) blocks (last two block dims equal the full array dims,
    # so the (8, 128) rule is always satisfied).
    kernel = functools.partial(_pe_kernel_3d, rate=float(rate),
                               training=bool(training))
    return pl.pallas_call(
        kernel,
        out_shape=jax.ShapeDtypeStruct((S, B, D), x.dtype),
        grid_spec=pltpu.PrefetchScalarGridSpec(
            num_scalar_prefetch=1,
            grid=(n_tiles,),
            in_specs=[
                pl.BlockSpec((ts, B, D), lambda i, seed: (i, 0, 0)),
                pl.BlockSpec((ts, 1, D), lambda i, seed: (i, 0, 0)),
            ],
            out_specs=pl.BlockSpec((ts, B, D), lambda i, seed: (i, 0, 0)),
        ),
        compiler_params=compiler_params,
    )(seed_arr, x, pe)


if __name__ == "__main__":
    key = jax.random.PRNGKey(0)
    k1, k2 = jax.random.split(key)

    # --- small, lane-unaligned case (exercises the (S, B, D) fallback path) ---
    d_model, batch, seq, max_len = 32, 2, 8, 64
    x = jax.random.normal(k1, (seq, batch, d_model), dtype=jnp.float32)
    pe = make_positional_encoding_table(d_model, max_len=max_len)

    out = positional_encoding(x, pe, rate=0.1, training=False, seed=0)
    out = jax.block_until_ready(out)
    ref = x + pe[:seq]
    assert out.shape == x.shape and out.dtype == x.dtype
    assert jnp.allclose(out, ref, atol=1e-6, rtol=1e-6)

    # --- lane-aligned case (exercises the lane-dense (S, B*D) path) ---
    d_model2, batch2, seq2, max_len2 = 128, 2, 16, 64
    x2 = jax.random.normal(k2, (seq2, batch2, d_model2), dtype=jnp.float32)
    pe2 = make_positional_encoding_table(d_model2, max_len=max_len2)

    out2 = positional_encoding(x2, pe2, rate=0.1, training=False, seed=0)
    out2 = jax.block_until_ready(out2)
    ref2 = x2 + pe2[:seq2]
    assert out2.shape == x2.shape and out2.dtype == x2.dtype
    assert jnp.allclose(out2, ref2, atol=1e-6, rtol=1e-6)

    # --- training mode (inverted dropout) smoke test on the aligned path ---
    out_tr = positional_encoding(x2, pe2, rate=0.1, training=True, seed=123)
    out_tr = jax.block_until_ready(out_tr)
    assert out_tr.shape == x2.shape
    assert bool(jnp.all(jnp.isfinite(out_tr)))
    dropped_frac = float(jnp.mean((out_tr == 0.0).astype(jnp.float32)))
    kept_ok = float(jnp.mean(
        ((jnp.abs(out_tr - ref2 / (1.0 - 0.1)) < 1e-5) | (out_tr == 0.0))
        .astype(jnp.float32)))
    assert 0.01 <= dropped_frac <= 0.30, dropped_frac   # ~10% of elements dropped
    assert kept_ok > 0.999, kept_ok                     # kept values are scaled x+pe

    # --- training mode smoke test on the fallback (lane-unaligned) path ---
    out_tr3 = positional_encoding(x, pe, rate=0.1, training=True, seed=7)
    out_tr3 = jax.block_until_ready(out_tr3)
    assert out_tr3.shape == x.shape
    assert bool(jnp.all(jnp.isfinite(out_tr3)))
    kept_ok3 = float(jnp.mean(
        ((jnp.abs(out_tr3 - ref / (1.0 - 0.1)) < 1e-5) | (out_tr3 == 0.0))
        .astype(jnp.float32)))
    assert kept_ok3 > 0.999, kept_ok3

    print("KERNEL_OK")
</pallas_src>

<mosaic_0001>
module attributes {stable_mosaic.version = 11 : i64} {
  func.func @_pe_kernel_3d(%arg0: i32, %arg1: memref<1xi32, #tpu.memory_space<smem>>, %arg2: memref<8x2x32xf32, #tpu.memory_space<vmem>>, %arg3: memref<8x1x32xf32, #tpu.memory_space<vmem>>, %arg4: memref<8x2x32xf32, #tpu.memory_space<vmem>>) attributes {dimension_semantics = [#tpu.dimension_semantics<parallel>], iteration_bounds = array<i64: 1>, scalar_prefetch = 1 : i64, scratch_operands = 0 : i64, tpu.core_type = #tpu.core_type<tc>, window_params = [{transform_indices = @transform_0, window_bounds = array<i64: 8, 2, 32>}, {transform_indices = @transform_1, window_bounds = array<i64: 8, 1, 32>}, {transform_indices = @transform_2, window_bounds = array<i64: 8, 2, 32>}]} {
    %c0 = arith.constant 0 : index
    %c0_0 = arith.constant 0 : index
    %c0_1 = arith.constant 0 : index
    %0 = vector.load %arg2[%c0, %c0_0, %c0_1] : memref<8x2x32xf32, #tpu.memory_space<vmem>>, vector<8x2x32xf32>
    %c0_2 = arith.constant 0 : index
    %c0_3 = arith.constant 0 : index
    %c0_4 = arith.constant 0 : index
    %1 = vector.load %arg3[%c0_2, %c0_3, %c0_4] : memref<8x1x32xf32, #tpu.memory_space<vmem>>, vector<8x1x32xf32>
    %2 = vector.broadcast %1 : vector<8x1x32xf32> to vector<8x2x32xf32>
    %3 = arith.addf %0, %2 : vector<8x2x32xf32>
    %c0_5 = arith.constant 0 : index
    %c0_6 = arith.constant 0 : index
    %c0_7 = arith.constant 0 : index
    %4 = vector.load %arg4[%c0_5, %c0_6, %c0_7] : memref<8x2x32xf32, #tpu.memory_space<vmem>>, vector<8x2x32xf32>
    tpu.vector_store %arg4[%c0_5, %c0_6, %c0_7], %3 {strides = array<i32>} : memref<8x2x32xf32, #tpu.memory_space<vmem>>, vector<8x2x32xf32>,
    return
  }
  func.func @transform_0(%arg0: i32, %arg1: memref<1xi32, #tpu.memory_space<smem>>) -> (i32, i32, i32) {
    %c0_i32 = arith.constant 0 : i32
    %c0_i32_0 = arith.constant 0 : i32
    %c0_i32_1 = arith.constant 0 : i32
    return %arg0, %c0_i32, %c0_i32_0 : i32, i32, i32
  }
  func.func @transform_1(%arg0: i32, %arg1: memref<1xi32, #tpu.memory_space<smem>>) -> (i32, i32, i32) {
    %c0_i32 = arith.constant 0 : i32
    %c0_i32_0 = arith.constant 0 : i32
    %c0_i32_1 = arith.constant 0 : i32
    return %arg0, %c0_i32, %c0_i32_0 : i32, i32, i32
  }
  func.func @transform_2(%arg0: i32, %arg1: memref<1xi32, #tpu.memory_space<smem>>) -> (i32, i32, i32) {
    %c0_i32 = arith.constant 0 : i32
    %c0_i32_0 = arith.constant 0 : i32
    %c0_i32_1 = arith.constant 0 : i32
    return %arg0, %c0_i32, %c0_i32_0 : i32, i32, i32
  }
}

</mosaic_0001>

<bundles_post_ra>
// kernel: tpu_custom_call.1
= control target key start
LH: loop header
LB: loop body
LE: loop exit
PB: predicated region body
PF: predicated region fallthrough
CT: control target
= control target key end

     0   :  { %vm86_vm0 = vcmask 254976   ;;  %s237_s0 = inlined_call_operand.<no memory space> [shape: s32[1], index: 0, kind: input, shape index: {}]   ;;  %s238_s1 = inlined_call_operand.vmem [shape: f32[8,2,32], index: 1, kind: input, shape index: {}]   ;;  %s239_s2 = inlined_call_operand.vmem [shape: f32[64,1,32], index: 2, kind: input, shape index: {}]   ;;  %s240_s3 = inlined_call_operand.hbm [shape: f32[8,2,32], index: 3, kind: output, shape index: {}]  }
   0x1   :  { %v14_v0 = vld [vmem:[%s238_s1] sm:$0x3]  ;;  %v15_v3 = vld [vmem:[%s238_s1 + $0x2] sm:$0x3]  ;;  %v16_v5 = vld [vmem:[%s238_s1 + $0x4] sm:$0x3] }
   0x2   :  { %v111_v1 = vld [vmem:[%s239_s2] ss:$0 sm:$0xff]  ;;  %v112_v4 = vld [vmem:[%s239_s2 + $0x1] ss:$0 sm:$0xff]  ;;  %v113_v7 = vld [vmem:[%s239_s2 + $0x2] ss:$0 sm:$0xff] }
   0x3   :  { %v78_v2 = vadd.f32 %v111_v1, %v14_v0  ;;  %v79_v6 = vadd.f32 %v112_v4, %v15_v3  ;;  %v17_v8 = vld [vmem:[%s238_s1 + $0x6] sm:$0x3]  ;;  %v114_v9 = vld [vmem:[%s239_s2 + $0x3] ss:$0 sm:$0xff]  ;;  %v80_v10 = vadd.f32 %v113_v7, %v16_v5  ;;  %v18_v12 = vld [vmem:[%s238_s1 + $0x8] sm:$0x3] }
   0x4   :  { %v81_v11 = vadd.f32 %v114_v9, %v17_v8  ;;  %v115_v13 = vld [vmem:[%s239_s2 + $0x4] ss:$0 sm:$0xff]  ;;  %v19_v14 = vld [vmem:[%s238_s1 + $0xa] sm:$0x3]  ;;  %v116_v16 = vld [vmem:[%s239_s2 + $0x5] ss:$0 sm:$0xff] }
   0x5   :  { %87 = vst.msk [vmem:[#allocation4] sm:$0x3] %vm86_vm0, %v78_v2  ;;  %88 = vst.msk [vmem:[#allocation4 + $0x2] sm:$0x3] %vm86_vm0, %v79_v6  ;;  %v82_v15 = vadd.f32 %v115_v13, %v18_v12  ;;  %v20_v17 = vld [vmem:[%s238_s1 + $0xc] sm:$0x3]  ;;  %v83_v19 = vadd.f32 %v116_v16, %v19_v14 }
   0x6   :  { %v117_v18 = vld [vmem:[%s239_s2 + $0x6] ss:$0 sm:$0xff]  ;;  %89 = vst.msk [vmem:[#allocation4 + $0x4] sm:$0x3] %vm86_vm0, %v80_v10  ;;  %90 = vst.msk [vmem:[#allocation4 + $0x6] sm:$0x3] %vm86_vm0, %v81_v11 }
   0x7   :  { %v84_v20 = vadd.f32 %v117_v18, %v20_v17  ;;  %v21_v21 = vld [vmem:[%s238_s1 + $0xe] sm:$0x3]  ;;  %v118_v22 = vld [vmem:[%s239_s2 + $0x7] ss:$0 sm:$0xff] }
   0x8   :  { %9 = vsyncpa [#allocation5], 0  ;;  %91 = vst.msk [vmem:[#allocation4 + $0x8] sm:$0x3] %vm86_vm0, %v82_v15  ;;  %v85_v23 = vadd.f32 %v118_v22, %v21_v21  ;;  %s146_s0 = smov [#allocation4]  }
   0x9   :  { %s100_s16 = sshll.u32 %s146_s0, 4  ;;  %92 = vst.msk [vmem:[#allocation4 + $0xa] sm:$0x3] %vm86_vm0, %v83_v19  ;;  %93 = vst.msk [vmem:[#allocation4 + $0xc] sm:$0x3] %vm86_vm0, %v84_v20  ;;  %s101_s16 = int_to_ptr.vmem [resolvable:$true] %s100_s16 }
   0xa   :  { %94 = vst.msk [vmem:[#allocation4 + $0xe] sm:$0x3] %vm86_vm0, %v85_v23  ;;  %s122_s17 = scalar_lea.vmem %s101_s16, 256  ;;  %p127_p1 = scmp.lt.s32.totalorder %s101_s16, %s101_s16 }
   0xb   :  { %p123_p0 = scmp.ne.s32.totalorder %s101_s16, %s122_s17  ;;  %p128_p2 = scmp.lt.s32.totalorder %s122_s17, %s122_s17 }
   0xd   :  { %p129_p3 = por %p128_p2, %p127_p1 }
   0xf   :  { %p130_p4 = pnand %p129_p3, %p123_p0 }
  0x11   :  { %133 = shalt.err (!%p130_p4)
}
  0x12   :  { %s134_s18 = scalar_lea.hbm %s240_s3, 256 }
  0x13   :  { %p135_p5 = scmp.ne.s32.totalorder %s240_s3, %s134_s18  ;;  %p138_p6 = scmp.lt.u32.totalorder %s134_s18, %s240_s3 }
  0x15   :  { %p140_p7 = pnand %p138_p6, %p135_p5 }
  0x17   :  { %143 = shalt.err (!%p140_p7)
}
  0x18   :  { %s147_s23 = smov 32   ;;  %s148_s24 = smov 2  }
  0x19   :  { %106 = dma.vmem_to_hbm [thread:$0]  %s101_s16, 256, %s240_s3, [#allocation5], %s147_s23, %s147_s23, %s148_s24  }
  0x1a   :  { %144 = dma.done.wait [#allocation5], 256  }
  0x1b   :  { %145 = vsyncadd [#allocation5], 4294967040 }
  0x1c   :  { %110 = vsyncpa [#allocation5], 1 }

</bundles_post_ra>
